<compile_context>
chip_gen: v5e
topology: v5e:2x2
jax: 0.10.0
libtpu: 0.0.40
codegen_flags: <defaults>
</compile_context>

<pallas_src>
import jax
import jax.numpy as jnp
from jax.experimental import pallas as pl
from jax.experimental.pallas import tpu as pltpu


# ----------------------------------------------------------------------------
# Pallas kernel: per-batch spatial sum of (1, C, TS) tiles, f32 accumulation
# directly in the resident (lane-dense over C) output block.
# ----------------------------------------------------------------------------
def _spatial_sum_kernel(x_ref, o_ref):
    # x_ref: (1, C, TS)   o_ref: (1, 1, 1, C)  (same block across the k axis)
    @pl.when(pl.program_id(2) == 0)
    def _init():
        o_ref[...] = jnp.zeros_like(o_ref)

    # Accumulate in f32 without materializing a widened copy of the tile.
    part = jnp.sum(x_ref[...], axis=-1, dtype=jnp.float32)   # (1, C)
    o_ref[...] += part[:, None, None, :]                     # (1, 1, 1, C)


def _vmem_capacity_bytes():
    """Chip VMEM capacity (bytes); conservative-safe fallback if query fails."""
    try:
        return int(pltpu.get_tpu_info().vmem_capacity_bytes)
    except Exception:
        # Fallback only affects the *cap*; the actual limit is derived from the
        # real per-block need below, so this stays safe even on 64 MiB chips.
        return 128 << 20


def _plan_spatial_tiling(s, c, itemsize, block_budget_bytes):
    """Return (s_pad, ts): padded spatial extent and spatial tile size.

    ts is a multiple of 128 chosen from a byte budget; s_pad is a multiple of
    ts (the wrapper zero-pads if s_pad != s, which leaves the sum unchanged).
    """
    ts_budget = max(128, (block_budget_bytes // (c * itemsize)) // 128 * 128)
    s_pad128 = ((s + 127) // 128) * 128
    if ts_budget >= s_pad128:
        # Whole (padded) spatial extent in one block -> K == 1, no k-loop work.
        return s_pad128, s_pad128
    if s % 128 == 0:
        # Largest multiple-of-128 divisor of s that fits the budget.
        ts = ts_budget
        while s % ts != 0:
            ts -= 128
        if ts * 2 >= ts_budget:          # divisor close to budget: no padding
            return s, ts
    # Awkward divisibility (or s not a multiple of 128): pad up to the budget tile.
    ts = ts_budget
    s_pad = ((s + ts - 1) // ts) * ts
    return s_pad, ts


def _spatial_sum(x_ncs, *, block_budget_bytes=None):
    """x_ncs: (N, C, S) -> (N, C) spatial sums (f32), via a tiled Pallas reduction."""
    N, C, S = x_ncs.shape
    itemsize = x_ncs.dtype.itemsize
    vmem_cap = _vmem_capacity_bytes()
    if block_budget_bytes is None:
        # ~8 MiB per block, but never more than ~1/6 of VMEM so the
        # double-buffered input + output + compiler scratch stay well inside.
        block_budget_bytes = int(min(8 << 20, vmem_cap // 6))

    S_pad, TS = _plan_spatial_tiling(S, C, itemsize, block_budget_bytes)
    if S_pad != S:
        x_ncs = jnp.pad(x_ncs, ((0, 0), (0, 0), (0, S_pad - S)))
    num_tiles = S_pad // TS

    # Partial-sum split only when the batch axis gives no parallelism
    # (keeps both v7x TensorCores busy at N == 1; pure overhead otherwise).
    P = 2 if (N == 1 and num_tiles >= 2 and num_tiles % 2 == 0) else 1
    K = num_tiles // P

    block_bytes = C * TS * itemsize
    out_bytes = P * C * 4
    vmem_needed = 2 * block_bytes + 2 * out_bytes + (2 << 20)   # dbl-buf in + out + headroom
    vmem_limit = int(min(max(vmem_needed, 8 << 20), (vmem_cap * 3) // 4))

    sums = pl.pallas_call(
        _spatial_sum_kernel,
        out_shape=jax.ShapeDtypeStruct((N, P, 1, C), jnp.float32),
        grid=(N, P, K),
        in_specs=[
            pl.BlockSpec((1, C, TS), lambda n, p, k, K=K: (n, 0, p * K + k)),
        ],
        out_specs=pl.BlockSpec((1, 1, 1, C), lambda n, p, k: (n, p, 0, 0)),
        compiler_params=pltpu.CompilerParams(
            dimension_semantics=("parallel", "parallel", "arbitrary"),
            vmem_limit_bytes=vmem_limit,
        ),
    )(x_ncs)

    return jnp.sum(sums.reshape(N, P, C), axis=1)    # (N, C)


# ----------------------------------------------------------------------------
# pose_matrix(dof, 'axis')  == transformation_from_parameters(r, t) == T @ R
# (monodepth2-style axis-angle -> rotation, translation -> homogeneous 4x4)
# ----------------------------------------------------------------------------
def _rot_from_axisangle(r):
    # r: (N, 3) axis-angle vector
    angle = jnp.linalg.norm(r, axis=-1, keepdims=True)   # (N, 1)
    axis = r / (angle + 1e-7)
    ca = jnp.cos(angle)[:, 0]
    sa = jnp.sin(angle)[:, 0]
    C = 1.0 - ca
    x, y, z = axis[:, 0], axis[:, 1], axis[:, 2]
    xs, ys, zs = x * sa, y * sa, z * sa
    xC, yC, zC = x * C, y * C, z * C
    xyC, yzC, zxC = x * yC, y * zC, z * xC
    N = r.shape[0]
    rot = jnp.zeros((N, 4, 4), dtype=r.dtype)
    rot = rot.at[:, 0, 0].set(x * xC + ca)
    rot = rot.at[:, 0, 1].set(xyC - zs)
    rot = rot.at[:, 0, 2].set(zxC + ys)
    rot = rot.at[:, 1, 0].set(xyC + zs)
    rot = rot.at[:, 1, 1].set(y * yC + ca)
    rot = rot.at[:, 1, 2].set(yzC - xs)
    rot = rot.at[:, 2, 0].set(zxC - ys)
    rot = rot.at[:, 2, 1].set(yzC + xs)
    rot = rot.at[:, 2, 2].set(z * zC + ca)
    rot = rot.at[:, 3, 3].set(1.0)
    return rot


def _translation_matrix(t):
    N = t.shape[0]
    T = jnp.tile(jnp.eye(4, dtype=t.dtype)[None], (N, 1, 1))
    T = T.at[:, :3, 3].set(t)
    return T


def _pose_matrix_axis(dof):
    r = dof[:, :3]   # rotation (axis-angle)
    t = dof[:, 3:]   # translation
    R = _rot_from_axisangle(r)
    T = _translation_matrix(t)
    return jnp.einsum('nij,njk->nik', T, R)


# ----------------------------------------------------------------------------
# Full PoseDecoder forward (default config: n_filters=[]).
# TODO(synk): strided 3x3 conv stack for non-empty n_filters not implemented.
# ----------------------------------------------------------------------------
def pose_decoder_forward(x_nchw, w_oihw, b_o, *, block_budget_bytes=None):
    N, C, H, W = x_nchw.shape
    S = H * W
    # No transpose: just flatten spatial dims -> (N, C, S), lane-dense over S.
    x_ncs = x_nchw.reshape(N, C, S)
    x_sum = _spatial_sum(x_ncs, block_budget_bytes=block_budget_bytes)    # (N, C)

    # Tiny epilogue: mean(conv1x1(x)) == mean(x) @ W + b  (linearity).
    w_cd = jnp.transpose(w_oihw[:, :, 0, 0]).astype(jnp.float32)          # (C, 6)
    pose_mean = (x_sum @ w_cd) * (1.0 / S) + b_o.astype(jnp.float32)[None, :]
    dof = 0.01 * pose_mean
    return _pose_matrix_axis(dof)                                         # (N, 4, 4)


def _reference_posemat(x, w, b):
    conv_ref = jnp.einsum('nchw,oc->nohw', x, w[:, :, 0, 0]) + b[None, :, None, None]
    pose_mean_ref = jnp.mean(conv_ref, axis=(2, 3))
    return _pose_matrix_axis(0.01 * pose_mean_ref)


if __name__ == "__main__":
    # Small deterministic example (PyTorch-style NCHW latent).
    N, C, H, W = 2, 32, 16, 32
    key = jax.random.PRNGKey(0)
    kx, kw, kb, kx2 = jax.random.split(key, 4)

    x = jax.random.normal(kx, (N, C, H, W), dtype=jnp.float32)

    # Deterministic kaiming_uniform-style init for the 1x1 conv (fan_in = C).
    fan_in = C * 1 * 1
    bound = (6.0 / fan_in) ** 0.5
    w = jax.random.uniform(kw, (6, C, 1, 1), jnp.float32, -bound, bound)
    b = jax.random.uniform(kb, (6,), jnp.float32,
                           -1.0 / fan_in ** 0.5, 1.0 / fan_in ** 0.5)

    posemat_ref = _reference_posemat(x, w, b)

    # 1) Tiny byte budget to exercise the tiled / accumulate path
    #    (TS=128, K=4, P=1 since N=2).
    posemat_tiled = jax.block_until_ready(
        pose_decoder_forward(x, w, b, block_budget_bytes=16 << 10))
    assert posemat_tiled.shape == (N, 4, 4) and posemat_tiled.dtype == jnp.float32
    assert jnp.allclose(posemat_tiled, posemat_ref, atol=1e-5, rtol=1e-5)

    # 2) N == 1 with a tiny budget to exercise the P=2 partial-sum split.
    posemat_p2 = jax.block_until_ready(
        pose_decoder_forward(x[:1], w, b, block_budget_bytes=16 << 10))
    assert jnp.allclose(posemat_p2, posemat_ref[:1], atol=1e-5, rtol=1e-5)

    # 3) Non-128-multiple spatial extent to exercise the zero-pad path.
    x_odd = jax.random.normal(kx2, (N, C, 6, 20), dtype=jnp.float32)   # S = 120
    posemat_odd = jax.block_until_ready(pose_decoder_forward(x_odd, w, b))
    assert jnp.allclose(posemat_odd, _reference_posemat(x_odd, w, b),
                        atol=1e-5, rtol=1e-5)

    # 4) Production default (byte-budget tile; single block per batch here).
    posemat = jax.block_until_ready(pose_decoder_forward(x, w, b))
    assert posemat.shape == (N, 4, 4) and posemat.dtype == jnp.float32
    assert jnp.allclose(posemat, posemat_ref, atol=1e-5, rtol=1e-5)

    print("KERNEL_OK")
</pallas_src>

<mosaic_0001>
module attributes {stable_mosaic.version = 11 : i64} {
  func.func @_spatial_sum_kernel(%arg0: i32, %arg1: i32, %arg2: i32, %arg3: memref<1x32x128xf32, #tpu.memory_space<vmem>>, %arg4: memref<1x1x1x32xf32, #tpu.memory_space<vmem>>) attributes {dimension_semantics = [#tpu.dimension_semantics<parallel>, #tpu.dimension_semantics<parallel>, #tpu.dimension_semantics<arbitrary>], iteration_bounds = array<i64: 2, 1, 4>, scalar_prefetch = 0 : i64, scratch_operands = 0 : i64, tpu.core_type = #tpu.core_type<tc>, window_params = [{transform_indices = @transform_0, window_bounds = array<i64: 1, 32, 128>}, {transform_indices = @transform_1, window_bounds = array<i64: 1, 1, 1, 32>}]} {
    %c0_i32 = arith.constant 0 : i32
    %0 = arith.cmpi eq, %arg2, %c0_i32 : i32
    %1 = arith.extui %0 : i1 to i32
    %c0_i32_0 = arith.constant 0 : i32
    %2 = arith.cmpi ne, %1, %c0_i32_0 : i32
    scf.if %2 {
      %cst_11 = arith.constant 0.000000e+00 : f32
      %9 = vector.broadcast %cst_11 : f32 to vector<1x1x1x32xf32>
      %c0_12 = arith.constant 0 : index
      %c0_13 = arith.constant 0 : index
      %c0_14 = arith.constant 0 : index
      %c0_15 = arith.constant 0 : index
      %10 = vector.load %arg4[%c0_12, %c0_13, %c0_14, %c0_15] : memref<1x1x1x32xf32, #tpu.memory_space<vmem>>, vector<1x1x1x32xf32>
      tpu.vector_store %arg4[%c0_12, %c0_13, %c0_14, %c0_15], %9 {strides = array<i32>} : memref<1x1x1x32xf32, #tpu.memory_space<vmem>>, vector<1x1x1x32xf32>,
    } else {
    }
    %c0 = arith.constant 0 : index
    %c0_1 = arith.constant 0 : index
    %c0_2 = arith.constant 0 : index
    %3 = vector.load %arg3[%c0, %c0_1, %c0_2] : memref<1x32x128xf32, #tpu.memory_space<vmem>>, vector<1x32x128xf32>
    %cst = arith.constant dense<0.000000e+00> : vector<1x32xf32>
    %4 = vector.multi_reduction <add>, %3, %cst [2] : vector<1x32x128xf32> to vector<1x32xf32>
    %c0_3 = arith.constant 0 : index
    %c0_4 = arith.constant 0 : index
    %c0_5 = arith.constant 0 : index
    %c0_6 = arith.constant 0 : index
    %5 = vector.load %arg4[%c0_3, %c0_4, %c0_5, %c0_6] : memref<1x1x1x32xf32, #tpu.memory_space<vmem>>, vector<1x1x1x32xf32>
    %6 = vector.shape_cast %4 : vector<1x32xf32> to vector<1x1x1x32xf32>
    %7 = arith.addf %5, %6 : vector<1x1x1x32xf32>
    %c0_7 = arith.constant 0 : index
    %c0_8 = arith.constant 0 : index
    %c0_9 = arith.constant 0 : index
    %c0_10 = arith.constant 0 : index
    %8 = vector.load %arg4[%c0_7, %c0_8, %c0_9, %c0_10] : memref<1x1x1x32xf32, #tpu.memory_space<vmem>>, vector<1x1x1x32xf32>
    tpu.vector_store %arg4[%c0_7, %c0_8, %c0_9, %c0_10], %7 {strides = array<i32>} : memref<1x1x1x32xf32, #tpu.memory_space<vmem>>, vector<1x1x1x32xf32>,
    return
  }
  func.func @transform_0(%arg0: i32, %arg1: i32, %arg2: i32) -> (i32, i32, i32) {
    %c4_i32 = arith.constant 4 : i32
    %0 = arith.muli %arg1, %c4_i32 : i32
    %1 = arith.addi %0, %arg2 : i32
    %c0_i32 = arith.constant 0 : i32
    %c0_i32_0 = arith.constant 0 : i32
    return %arg0, %c0_i32, %1 : i32, i32, i32
  }
  func.func @transform_1(%arg0: i32, %arg1: i32, %arg2: i32) -> (i32, i32, i32, i32) {
    %c0_i32 = arith.constant 0 : i32
    %c0_i32_0 = arith.constant 0 : i32
    %c0_i32_1 = arith.constant 0 : i32
    return %arg0, %arg1, %c0_i32, %c0_i32_0 : i32, i32, i32, i32
  }
}

</mosaic_0001>

<bundles_post_ra>
// kernel: tpu_custom_call.1
= control target key start
LH: loop header
LB: loop body
LE: loop exit
PB: predicated region body
PF: predicated region fallthrough
CT: control target
= control target key end

     0   :  { %6 = vsyncpa [#allocation3], 0  ;;  %s864_s0 = inlined_call_operand.hbm [shape: f32[2,32,512], index: 0, kind: input, shape index: {}]   ;;  %s865_s1 = inlined_call_operand.hbm [shape: f32[2,1,1,32], index: 1, kind: output, shape index: {}]  }
   0x1   :  { %8 = vsyncpa [#allocation3 + $0x1], 0 }
   0x2   :  { %9 = vsyncpa [#allocation4], 0 }
   0x3   :  { %11 = vsyncpa [#allocation4 + $0x1], 0  ;;  %s687_s6 = smov 0   ;;  %s689_s7 = smov 0  }
   0x4   :  { %s691_s8 = smov 0   ;;  %s693_s9 = smov 0  }
   0x5   :  { %s695_s10 = smov 0   ;;  %s697_s11 = smov 0  }
   0x6   :  { %s699_s12 = smov 0   ;;  %s701_s13 = smov 0  }
   0x7   :  { %s703_s14 = smov 0   ;;  %s705_s15 = smov 0  }
   0x8   :  { %s707_s16 = smov 0  }
   0x9 LB: > { %869 = sst [smem:[#allocation8_spill]] %s650_s11  ;;  %s396_s17 = sadd.s32 4294967295, %s670_s16   ;;  %s670_s16 = sphi %s707_s16, %s17_s16   ;;  %s666_s15 = sphi %s705_s15, %s889_s15   ;;  %s662_s14 = sphi %s703_s14, %s888_s14   ;;  %s658_s13 = sphi %s701_s13, %s887_s13   ;;  %s654_s12 = sphi %s699_s12, %s886_s12   ;;  %s650_s11 = sphi %s697_s11, %s878_s11   ;;  %s646_s10 = sphi %s695_s10, %s885_s10   ;;  %s642_s9 = sphi %s693_s9, %s884_s9   ;;  %s638_s8 = sphi %s691_s8, %s883_s8   ;;  %s634_s7 = sphi %s689_s7, %s882_s7   ;;  %s630_s6 = sphi %s687_s6, %s881_s6  }
   0xa   : > { %s397_s18 = sadd.s32 4294967294, %s670_s16   ;;  %s29_s19 = sadd.s32 1, %s662_s14 }
   0xb   : > { %s36_s20 = sadd.s32 1, %s666_s15  ;;  %p30_p0 = scmp.ge.s32.totalorder %s29_s19, 4 }
   0xc   : > { %s49_s21 = sadd.s32 1, %s650_s11  ;;  %p56_p1 = scmp.ne.s32.totalorder %s650_s11, %s646_s10 }
   0xd   : > { %p57_p2 = scmp.eq.s32.totalorder %s670_s16, 0  ;;  %s891_s19 = smov (%p30_p0, %s29_s19), 0 }
   0xe   : > { %870 = sst [smem:[#allocation9_spill]] %s891_s19  ;;  %s893_s20 = smov (!%p30_p0, %s36_s20), %s666_s15 }
   0xf   : > { %s45_s22 = ssub.s32 %s662_s14, %s891_s19  ;;  %p753_p3 = por %p57_p2, %p56_p1 }
  0x10   : > { %p38_p4 = scmp.ge.s32.totalorder %s893_s20, 2  ;;  %p62_p5 = scmp.ne.s32.totalorder %s646_s10, %s642_s9 }
  0x11   : > { %p63_p6 = scmp.eq.s32.totalorder %s396_s17, 0  ;;  %s77_s24 = sadd.s32 1, %s638_s8 }
  0x12   : > { %s895_s20 = smov (%p38_p4, %s893_s20), 0  ;;  %p87_p8 = scmp.ne.s32.totalorder %s638_s8, %s634_s7 }
  0x13   : > { %872 = sst [smem:[#allocation10_spill]] %s895_s20  ;;  %p761_p7 = por %p63_p6, %p62_p5 }
  0x14   : > { %s44_s26 = ssub.s32 %s666_s15, %s895_s20  ;;  %p88_p9 = scmp.eq.s32.totalorder %s396_s17, 7 }
  0x15   : > { %s46_s27 = sor.u32 %s45_s22, %s44_s26  ;;  %p75_p10 = scmp.eq.s32.totalorder %s44_s26, 0 }
  0x16   : > { %p47_p11 = scmp.eq.s32.totalorder %s46_s27, 0  ;;  %p769_p12 = por %p88_p9, %p87_p8 }
  0x17   : > { %s774_s29 = scalar_select %p75_p10, %s638_s8, %s77_s24  }
  0x18   : > { %s777_s30 = scalar_select %p47_p11, %s650_s11, %s49_s21  }
  0x19   : > { %p93_p13 = scmp.ne.s32.totalorder %s634_s7, %s630_s6  ;;  %p94_p0 = scmp.eq.s32.totalorder %s397_s18, 7 }
  0x1a   : > { %875 = sst [smem:[#allocation11_spill]] %s777_s30  ;;  %p420_p1 = scmp.lt.s32.totalorder %s670_s16, 8 }
  0x1b   : > { %p782_p2 = por %p94_p0, %p93_p13  ;;  %s114_s3 = sand.u32 1, %s650_s11  }
  0x1c   : > { %s400_s4 = sshll.u32 %s114_s3, 5  ;;  %s401_s5 = sshll.u32 %s666_s15, 4 }
  0x1d   : > { %s124_s9 = sadd.s32 %s662_s14, %s401_s5  ;;  %s118_s17 = scalar_lea.vmem [#allocation2], %s400_s4 }
  0x1e   : > { %s129_s22 = sshll.u32 %s118_s17, 4  ;;  %s402_s26 = sshll.u32 %s124_s9, 3  ;;  %s130_s22 = int_to_ptr.vmem [resolvable:$true] %s129_s22 }
  0x1f   : > { %s126_s27 = scalar_lea.hbm %s864_s0, %s402_s26  ;;  %p413_p4 = pnand %p420_p1, %p753_p3 }
  0x20   : > { %s127_s18 = sshll.u32 %s126_s27, 4  ;;  %s115_s20 = scalar_lea.sflag [#allocation3], %s114_s3  ;;  %s128_s18 = int_to_ptr.hbm [resolvable:$true] %s127_s18 }
  0x21   : > { %s672_s19 = smov 512   ;;  %s673_s30 = smov 128  }
  0x22   : > { %s674_s11 = smov 8   ;;  %p403_p5 = scmp.ge.s32.totalorder %s670_s16, 1 }
  0x23   : > { %415 = dma.hbm_to_vmem [thread:$0]  (!%p413_p4), %s128_s18, 512, %s130_s22, %s115_s20, %s672_s19, %s673_s30, %s674_s11  }
  0x24   : > { %p137_p6 = scmp.lt.s32.totalorder %s670_s16, 9 }
  0x26   : > { %p138_p8 = pnand %p403_p5, %p137_p6 }
  0x27   : > { %s143_s4 = sand.u32 (!%p138_p8), 1, %s646_s10  }
  0x28   : > { %141 = sbr.rel (%p138_p8) target bundleno = 357 (0x165), region = 24  ;;  %s404_s5 = sshll.u32 (!%p138_p8), %s143_s4, 5 }
  0x29   : > { %s144_s9 = scalar_lea.sflag (!%p138_p8), [#allocation3], %s143_s4  ;;  %s147_s17 = scalar_lea.vmem (!%p138_p8), [#allocation2], %s404_s5 }
  0x2d   : > { %621 = dma.done.wait (%p761_p7), %s144_s9, 512  }
  0x2e   : > { %623 = vsyncadd (%p761_p7), %s144_s9, 4294966784  ;;  %s164_s23 = sand.u32 1, %s634_s7   ;;  %p405_p3 = scmp.ne.s32.totalorder %s654_s12, 0 }
  0x2f   : > { %s804_s11 = scalar_lea.vmem [#allocation5], %s164_s23 }
  0x30   : > { %171 = sbr.rel (%p405_p3) target bundleno = 55 (0x37), region = 32 }
  0x35   : > { %vm172_vm0 = vcmask 253952   ;;  %v675_v0 = vmov 0.0  }
  0x36   : > { %173 = vst.msk [vmem:[%s804_s11] sm:$0x1] %vm172_vm0, %v675_v0 }
  0x37 PF: > { %v174_v1 = vld [vmem:[%s147_s17] sm:$0xff]  ;;  %v176_v2 = vld [vmem:[%s147_s17 + $0x10] sm:$0xff]  ;;  %v175_v3 = vld [vmem:[%s147_s17 + $0x8] sm:$0xff]  ;;  %v676_v5 = vmov 0   ;;  %v278_v47 = vlaneseq  ;;  %vm283_vm1 = vcmask 130112   ;;  %s307_s20 = scalar_lea.hbm %s865_s1, %s658_s13  ;;  %vm287_vm2 = vcmask 195712  }
  0x38   : > { %178 = vadd.xlane.f32.xlu0 %v174_v1  ;;  %182 = vadd.xlane.f32.xlu1 %v176_v2  ;;  %v177_v4 = vld [vmem:[%s147_s17 + $0x18] sm:$0xff]  ;;  %vm291_vm3 = vcmask 261312   ;;  %s309_s25 = sshll.u32 %s804_s11, 4  ;;  %s311_s30 = sshll.u32 %s307_s20, 4  ;;  %vm295_vm4 = vcmask 253952   ;;  %s310_s25 = int_to_ptr.vmem [resolvable:$true] %s309_s25  ;;  %s312_s30 = int_to_ptr.hbm [resolvable:$true] %s311_s30 }
  0x39   : > { %515 = vset.pattern.permute.xlu2 %v676_v5  ;;  %516 = vset.pattern.permute.xlu0 %v676_v5  ;;  %v279_v48 = vand.u32 127, %v278_v47  ;;  %s298_s13 = scalar_lea.sflag [#allocation4], %s164_s23  ;;  %s562_s3 = sshra.s32 %s312_s30, 4  ;;  %s563_s3 = int_to_ptr.hbm [resolvable:$true] %s562_s3 }
  0x3a   : > { %517 = vset.pattern.permute.xlu1 %v676_v5  ;;  %s564_s22 = scalar_lea.hbm %s563_s3, 1  ;;  %s568_s21 = scalar_lea.hbm %s865_s1, 2 }
  0x3b   : > { %v281_v49 = vadd.s32 4294967288, %v279_v48  ;;  %v285_v51 = vadd.s32 4294967280, %v279_v48  ;;  %v289_v54 = vadd.s32 4294967272, %v279_v48  ;;  %p565_p7 = scmp.ne.s32.totalorder %s563_s3, %s564_s22  ;;  %p569_p11 = scmp.lt.s32.totalorder %s563_s3, %s865_s1 }
  0x3c   : > { %p570_p13 = scmp.lt.s32.totalorder %s568_s21, %s564_s22 }
  0x3d   : > { %v186_v60 = vld [vmem:[%s804_s11] sm:$0x1]  ;;  %p566_p9 = pnand %p565_p7, %p769_p12 }
  0x3e   : > { %p571_p0 = por %p570_p13, %p569_p11 }
  0x3f   : > { %p567_p10 = pneg %p566_p9 }
  0x40   : > { %180 = vadd.xlane.f32.xlu0 %v175_v3  ;;  %184 = vadd.xlane.f32.xlu1 %v177_v4 }
  0x41   : > { %p572_p1 = pnand %p571_p0, %p567_p10 }
  0xab   : > { %v179_v6 = vpop.xlane.xlu0 %178  ;;  %v183_v25 = vpop.xlane.xlu1 %182 }
  0xac   : > { %v191_v7 = vperm.slane %v179_v6, 0  ;;  %v192_v8 = vperm.slane %v179_v6, 1  ;;  %v193_v9 = vperm.slane %v179_v6, 2  ;;  %v194_v10 = vperm.slane %v179_v6, 3 }
  0xad   : > { %v195_v11 = vperm.slane %v179_v6, 4  ;;  %v196_v12 = vperm.slane %v179_v6, 5  ;;  %v197_v13 = vperm.slane %v179_v6, 6  ;;  %v198_v14 = vperm.slane %v179_v6, 7 }
  0xae   : > { %223 = vst [vmem:[#allocation1] ss:$9 sm:$0xff] %v191_v7  ;;  %v207_v26 = vperm.slane %v183_v25, 0  ;;  %v208_v27 = vperm.slane %v183_v25, 1  ;;  %v209_v28 = vperm.slane %v183_v25, 2  ;;  %v210_v30 = vperm.slane %v183_v25, 3 }
  0xaf   : > { %225 = vst [vmem:[#allocation1 + $0x1] ss:$9 sm:$0xff] %v192_v8  ;;  %v211_v31 = vperm.slane %v183_v25, 4  ;;  %v212_v32 = vperm.slane %v183_v25, 5  ;;  %v213_v33 = vperm.slane %v183_v25, 6  ;;  %v214_v34 = vperm.slane %v183_v25, 7 }
  0xb0   : > { %227 = vst [vmem:[#allocation1 + $0x2] ss:$9 sm:$0xff] %v193_v9 }
  0xb1   : > { %229 = vst [vmem:[#allocation1 + $0x3] ss:$9 sm:$0xff] %v194_v10 }
  0xb2   : > { %231 = vst [vmem:[#allocation1 + $0x4] ss:$9 sm:$0xff] %v195_v11 }
  0xb3   : > { %233 = vst [vmem:[#allocation1 + $0x5] ss:$9 sm:$0xff] %v196_v12  ;;  %v181_v15 = vpop.xlane.xlu0 %180  ;;  %v185_v35 = vpop.xlane.xlu1 %184 }
  0xb4   : > { %235 = vst [vmem:[#allocation1 + $0x6] ss:$9 sm:$0xff] %v197_v13  ;;  %v199_v16 = vperm.slane %v181_v15, 0  ;;  %v200_v17 = vperm.slane %v181_v15, 1  ;;  %v201_v18 = vperm.slane %v181_v15, 2  ;;  %v202_v20 = vperm.slane %v181_v15, 3 }
  0xb5   : > { %237 = vst [vmem:[#allocation1 + $0x7] ss:$9 sm:$0xff] %v198_v14  ;;  %v203_v21 = vperm.slane %v181_v15, 4  ;;  %v204_v22 = vperm.slane %v181_v15, 5  ;;  %v205_v23 = vperm.slane %v181_v15, 6  ;;  %v206_v24 = vperm.slane %v181_v15, 7 }
  0xb6   : > { %v215_v36 = vperm.slane %v185_v35, 0  ;;  %v216_v37 = vperm.slane %v185_v35, 1  ;;  %v217_v38 = vperm.slane %v185_v35, 2  ;;  %v218_v39 = vperm.slane %v185_v35, 3 }
  0xb7   : > { %v219_v41 = vperm.slane %v185_v35, 4  ;;  %v220_v42 = vperm.slane %v185_v35, 5  ;;  %v221_v43 = vperm.slane %v185_v35, 6  ;;  %v222_v44 = vperm.slane %v185_v35, 7 }
  0xbc   : > { %v238_v19 = vld [vmem:[#allocation1] sm:$0xff] }
  0xbd   : > { %239 = vst [vmem:[#allocation1] ss:$9 sm:$0xff] %v199_v16  ;;  %267 = vperm.xlu2 %515, %v238_v19  }
  0xbe   : > { %240 = vst [vmem:[#allocation1 + $0x1] ss:$9 sm:$0xff] %v200_v17 }
  0xbf   : > { %241 = vst [vmem:[#allocation1 + $0x2] ss:$9 sm:$0xff] %v201_v18 }
  0xc0   : > { %242 = vst [vmem:[#allocation1 + $0x3] ss:$9 sm:$0xff] %v202_v20 }
  0xc1   : > { %243 = vst [vmem:[#allocation1 + $0x4] ss:$9 sm:$0xff] %v203_v21 }
  0xc2   : > { %244 = vst [vmem:[#allocation1 + $0x5] ss:$9 sm:$0xff] %v204_v22 }
  0xc3   : > { %245 = vst [vmem:[#allocation1 + $0x6] ss:$9 sm:$0xff] %v205_v23 }
  0xc4   : > { %246 = vst [vmem:[#allocation1 + $0x7] ss:$9 sm:$0xff] %v206_v24 }
  0xcb   : > { %v247_v29 = vld [vmem:[#allocation1] sm:$0xff] }
  0xcc   : > { %248 = vst [vmem:[#allocation1] ss:$9 sm:$0xff] %v207_v26  ;;  %270 = vperm.xlu2 %515, %v247_v29  }
  0xcd   : > { %249 = vst [vmem:[#allocation1 + $0x1] ss:$9 sm:$0xff] %v208_v27 }
  0xce   : > { %250 = vst [vmem:[#allocation1 + $0x2] ss:$9 sm:$0xff] %v209_v28 }
  0xcf   : > { %251 = vst [vmem:[#allocation1 + $0x3] ss:$9 sm:$0xff] %v210_v30 }
  0xd0   : > { %252 = vst [vmem:[#allocation1 + $0x4] ss:$9 sm:$0xff] %v211_v31 }
  0xd1   : > { %253 = vst [vmem:[#allocation1 + $0x5] ss:$9 sm:$0xff] %v212_v32 }
  0xd2   : > { %254 = vst [vmem:[#allocation1 + $0x6] ss:$9 sm:$0xff] %v213_v33 }
  0xd3   : > { %255 = vst [vmem:[#allocation1 + $0x7] ss:$9 sm:$0xff] %v214_v34 }
  0xda   : > { %v256_v40 = vld [vmem:[#allocation1] sm:$0xff] }
  0xdb   : > { %273 = vperm.xlu0 %516, %v256_v40   ;;  %257 = vst [vmem:[#allocation1] ss:$9 sm:$0xff] %v215_v36 }
  0xdc   : > { %258 = vst [vmem:[#allocation1 + $0x1] ss:$9 sm:$0xff] %v216_v37 }
  0xdd   : > { %259 = vst [vmem:[#allocation1 + $0x2] ss:$9 sm:$0xff] %v217_v38 }
  0xde   : > { %260 = vst [vmem:[#allocation1 + $0x3] ss:$9 sm:$0xff] %v218_v39 }
  0xdf   : > { %261 = vst [vmem:[#allocation1 + $0x4] ss:$9 sm:$0xff] %v219_v41 }
  0xe0   : > { %262 = vst [vmem:[#allocation1 + $0x5] ss:$9 sm:$0xff] %v220_v42 }
  0xe1   : > { %263 = vst [vmem:[#allocation1 + $0x6] ss:$9 sm:$0xff] %v221_v43 }
  0xe2   : > { %264 = vst [vmem:[#allocation1 + $0x7] ss:$9 sm:$0xff] %v222_v44 }
  0xe9   : > { %v265_v45 = vld [vmem:[#allocation1] sm:$0xff] }
  0xea   : > { %276 = vperm.xlu1 %517, %v265_v45  }
 0x117   : > { %v268_v46 = vpop.permute.xlu2 %267 }
 0x118   : > { %v280_v56 = vperm.slane %v268_v46, %v279_v48 }
 0x126   : > { %v271_v50 = vpop.permute.xlu2 %270 }
 0x127   : > { %v282_v53 = vperm.slane %v271_v50, %v281_v49 }
 0x129   : > { %v284_v58 = vsel %vm283_vm1, %v282_v53, %v280_v56 }
 0x14d   : > { %v274_v52 = vpop.permute.xlu0 %273 }
 0x14e   : > { %v286_v55 = vperm.slane %v274_v52, %v285_v51 }
 0x150   : > { %v288_v61 = vsel %vm287_vm2, %v286_v55, %v284_v58 }
 0x15c   : > { %v277_v57 = vpop.permute.xlu1 %276 }
 0x15d   : > { %v290_v59 = vperm.slane %v277_v57, %v289_v54 }
 0x15f   : > { %v292_v62 = vsel %vm291_vm3, %v290_v59, %v288_v61 }
 0x160   : > { %v294_v63 = vadd.f32 %v292_v62, %v186_v60 }
 0x162   : > { %296 = vst.msk [vmem:[%s804_s11] sm:$0x1] %vm295_vm4, %v294_v63 }
 0x163   : > { %575 = shalt.err (!%p572_p1)
}
 0x164   : > { %410 = dma.vmem_to_hbm [thread:$0]  (%p769_p12), %s310_s25, 16, %s312_s30, %s298_s13  }
 0x165 PF: > { %p421_p4 = scmp.ge.s32.totalorder %s670_s16, 2  ;;  %s323_s4 = sand.u32 1, %s630_s6  }
 0x166   : > { %s324_s5 = scalar_lea.sflag [#allocation4], %s323_s4 }
 0x167   : > { %p417_p5 = pnand %p421_p4, %p782_p2 }
 0x169   : > { %p418_p6 = pneg %p417_p5 }
 0x16b   : > { %625 = dma.done.wait (%p418_p6), %s324_s5, 16  }
 0x16c   : > { %627 = vsyncadd (%p418_p6), %s324_s5, 4294967280  ;;  %s17_s16 = sadd.s32 1, %s670_s16   ;;  %s877_s28 = sld [smem:[#allocation8_spill]] }
 0x16d   : > { %p14_p8 = scmp.ge.s32.totalorder %s17_s16, 10   ;;  %s878_s11 = sld [smem:[#allocation11_spill]] }
 0x16e   : > { %s879_s17 = sld [smem:[#allocation9_spill]]  ;;  %s881_s6 = smov %s634_s7 }
 0x16f   : > { %s880_s23 = sld [smem:[#allocation10_spill]]  ;;  %s882_s7 = smov %s638_s8 }
 0x170   : > { %s883_s8 = smov %s774_s29  ;;  %s884_s9 = smov %s646_s10 }
 0x171   : > { %s886_s12 = smov %s662_s14  ;;  %s887_s13 = smov %s666_s15 }
 0x172   : > { %s885_s10 = smov %s877_s28  ;;  %16 = sbr.rel (!%p14_p8) target bundleno = 9 (0x9), region = 80 }
 0x174   : > { %s888_s14 = smov %s879_s17 }
 0x175   : > { %s889_s15 = smov %s880_s23 }
 0x177   :  { %329 = vsyncpa [#allocation3], 1 }
 0x178   :  { %331 = vsyncpa [#allocation3 + $0x1], 1 }
 0x179   :  { %332 = vsyncpa [#allocation4], 1 }
 0x17a   :  { %334 = vsyncpa [#allocation4 + $0x1], 1 }

</bundles_post_ra>
